<compile_context>
chip_gen: v7x
topology: tpu7x:2x2x1
jax: 0.10.0
libtpu: 0.0.40
codegen_flags: <defaults>
</compile_context>

<pallas_src>
import functools

import jax
import jax.numpy as jnp
from jax.experimental import pallas as pl
from jax.experimental.pallas import tpu as pltpu

HIDDEN = 32                     # plm_hidden_size (small stand-in)
NUM_HEADS = 8                   # nn.MultiheadAttention(num_heads=8)
HEAD_DIM = HIDDEN // NUM_HEADS
LSTM_H = HIDDEN // 2            # nn.LSTM(hidden_size=hidden/2)
CLS_MID = 256                   # cls_head_linear1 output
NEG_SLOPE = 0.01                # nn.LeakyReLU default

_VMEM = pl.BlockSpec(memory_space=pltpu.MemorySpace.VMEM)


def _leaky(y):
    return jnp.where(y > 0, y, NEG_SLOPE * y)


# -----------------------------------------------------------------------------
# Linear (+ optional fused activation) kernel:  y = x @ W^T + b
# -----------------------------------------------------------------------------
def _linear_kernel(x_ref, w_ref, b_ref, o_ref, *, act):
    y = jnp.dot(x_ref[...], w_ref[...], preferred_element_type=jnp.float32) + b_ref[...]
    if act == "leaky_relu":
        y = _leaky(y)
    elif act == "tanh":
        y = jnp.tanh(y)
    o_ref[...] = y.astype(o_ref.dtype)


def pallas_linear(x, w_t, b, act="none"):
    n, dout = x.shape[0], w_t.shape[1]
    return pl.pallas_call(
        functools.partial(_linear_kernel, act=act),
        out_shape=jax.ShapeDtypeStruct((n, dout), jnp.float32),
        in_specs=[_VMEM, _VMEM, _VMEM],
        out_specs=_VMEM,
    )(x, w_t, b.reshape(1, -1))


# -----------------------------------------------------------------------------
# Fused classification head: linear1 + leaky_relu + (dropout=identity) + linear2.
# The (N, 256) intermediate never leaves VMEM.
# -----------------------------------------------------------------------------
def _cls_head_kernel(x_ref, w1_ref, b1_ref, w2_ref, b2_ref, o_ref):
    h = jnp.dot(x_ref[...], w1_ref[...], preferred_element_type=jnp.float32) + b1_ref[...]
    h = _leaky(h)
    # dropout(p=0.2) -> identity in eval mode (see TODO above)
    o_ref[...] = (jnp.dot(h, w2_ref[...], preferred_element_type=jnp.float32)
                  + b2_ref[...]).astype(o_ref.dtype)


def pallas_cls_head(x, w1_t, b1, w2_t, b2):
    n = x.shape[0]
    return pl.pallas_call(
        _cls_head_kernel,
        out_shape=jax.ShapeDtypeStruct((n, 2), jnp.float32),
        in_specs=[_VMEM] * 5,
        out_specs=_VMEM,
    )(x, w1_t, b1.reshape(1, -1), w2_t, b2.reshape(1, -1))


# -----------------------------------------------------------------------------
# Fused 2-layer bidirectional LSTM pooling over ALL items of the batch at once,
# followed by the linear-after-pooling + LeakyReLU (fused tail).
# PyTorch gate order i, f, g, o; per-item length freezes padded timesteps.
# Output row n == h_n[-2:] of item n's LSTM, then leaky(after_pool_linear(.)).
# -----------------------------------------------------------------------------
def _lstm_cell(xg_slab, h, c, whh, m):
    """xg_slab (N,4H) precomputed input gates; h,c (N,H); whh (H,4H); m (N,1)."""
    H = LSTM_H
    gates = xg_slab + jnp.dot(h, whh, preferred_element_type=jnp.float32)
    i_g = jax.nn.sigmoid(gates[:, 0:H])
    f_g = jax.nn.sigmoid(gates[:, H:2 * H])
    g_g = jnp.tanh(gates[:, 2 * H:3 * H])
    o_g = jax.nn.sigmoid(gates[:, 3 * H:4 * H])
    c_new = f_g * c + i_g * g_g
    h_new = o_g * jnp.tanh(c_new)
    # m is 1.0 for valid timesteps, 0.0 for padded ones (freeze the state).
    h = h + m * (h_new - h)
    c = c + m * (c_new - c)
    return h, c


def _bilstm_pool_kernel(x_ref, len_ref,
                        wih0_ref, whh0f_ref, whh0b_ref, b0_ref,
                        wih1_ref, whh1f_ref, whh1b_ref, b1_ref,
                        wap_ref, bap_ref, o_ref, *, t_max, n_items):
    H = LSTM_H
    lens = len_ref[...]                               # (N, 1) float32 lengths
    x = x_ref[...]                                    # (T_max*N, HIDDEN), time-major

    # Layer 0: input projection hoisted out of the time loop, BOTH directions
    # at once -> (T_max*N, 8H) = [fwd gates | bwd gates].
    xg0 = jnp.dot(x, wih0_ref[...], preferred_element_type=jnp.float32) + b0_ref[...]
    whh0f, whh0b = whh0f_ref[...], whh0b_ref[...]

    hf = jnp.zeros((n_items, H), jnp.float32); cf = jnp.zeros((n_items, H), jnp.float32)
    hb = jnp.zeros((n_items, H), jnp.float32); cb = jnp.zeros((n_items, H), jnp.float32)
    out_f = [None] * t_max
    out_b = [None] * t_max
    for t in range(t_max):
        mf = jnp.where(lens > t, 1.0, 0.0)                               # (N,1)
        hf, cf = _lstm_cell(xg0[t * n_items:(t + 1) * n_items, 0:4 * H],
                            hf, cf, whh0f, mf)
        out_f[t] = hf
        rt = t_max - 1 - t                     # backward sweep over valid region
        mb = jnp.where(lens > rt, 1.0, 0.0)
        hb, cb = _lstm_cell(xg0[rt * n_items:(rt + 1) * n_items, 4 * H:8 * H],
                            hb, cb, whh0b, mb)
        out_b[rt] = hb

    # Layer-0 output sequence stays in registers; build (T_max*N, 2H) time-major.
    x1 = jnp.concatenate(
        [jnp.concatenate([out_f[t], out_b[t]], axis=1) for t in range(t_max)], axis=0)

    # Layer 1: only the final hidden states are needed (no per-step stores).
    xg1 = jnp.dot(x1, wih1_ref[...], preferred_element_type=jnp.float32) + b1_ref[...]
    whh1f, whh1b = whh1f_ref[...], whh1b_ref[...]
    hf1 = jnp.zeros((n_items, H), jnp.float32); cf1 = jnp.zeros((n_items, H), jnp.float32)
    hb1 = jnp.zeros((n_items, H), jnp.float32); cb1 = jnp.zeros((n_items, H), jnp.float32)
    for t in range(t_max):
        mf = jnp.where(lens > t, 1.0, 0.0)
        hf1, cf1 = _lstm_cell(xg1[t * n_items:(t + 1) * n_items, 0:4 * H],
                              hf1, cf1, whh1f, mf)
        rt = t_max - 1 - t
        mb = jnp.where(lens > rt, 1.0, 0.0)
        hb1, cb1 = _lstm_cell(xg1[rt * n_items:(rt + 1) * n_items, 4 * H:8 * H],
                              hb1, cb1, whh1b, mb)

    pooled = jnp.concatenate([hf1, hb1], axis=1)                 # (N, HIDDEN)
    # Fused linear-after-pooling + LeakyReLU.
    y = jnp.dot(pooled, wap_ref[...], preferred_element_type=jnp.float32) + bap_ref[...]
    o_ref[...] = _leaky(y).astype(o_ref.dtype)


def bilstm_pool_batch(tokens, lens, p, wap_t, bap):
    """tokens (N, T_max, HIDDEN) padded spans, lens (N,) -> (N, HIDDEN)."""
    N, t_max, _ = tokens.shape
    # Time-major packing so each timestep is a contiguous (N, ...) slab.
    tokens_tm = jnp.transpose(tokens, (1, 0, 2)).reshape(t_max * N, HIDDEN)
    lens_col = lens.astype(jnp.float32).reshape(N, 1)
    return pl.pallas_call(
        functools.partial(_bilstm_pool_kernel, t_max=t_max, n_items=N),
        out_shape=jax.ShapeDtypeStruct((N, HIDDEN), jnp.float32),
        in_specs=[_VMEM] * 12,
        out_specs=_VMEM,
    )(tokens_tm, lens_col,
      p["wih0"], p["whh0f"], p["whh0b"], p["b0"],
      p["wih1"], p["whh1f"], p["whh1b"], p["b1"],
      wap_t, bap.reshape(1, -1))


# -----------------------------------------------------------------------------
# Fused 8-head cross attention for ALL tables of the batch (one kernel call):
#   Q/K/V projected once, per-head scores via a block-diagonal (32,8) selector
#   matmul, per-table column spans are static slices, then output projection,
#   residual add, and row-wise L2 normalize.
# -----------------------------------------------------------------------------
def _mha_kernel(t_ref, c_ref, wq_ref, wk_ref, wv_ref, bq_ref, bk_ref, bv_ref,
                wo_ref, bo_ref, sel_ref, selT_ref, o_ref, *, col_spans):
    tq = t_ref[...]                                                      # (N, E)
    cols = c_ref[...]                                                    # (C, E)
    q = jnp.dot(tq, wq_ref[...], preferred_element_type=jnp.float32) + bq_ref[...]
    k = jnp.dot(cols, wk_ref[...], preferred_element_type=jnp.float32) + bk_ref[...]
    v = jnp.dot(cols, wv_ref[...], preferred_element_type=jnp.float32) + bv_ref[...]
    sel, selT = sel_ref[...], selT_ref[...]
    scale = 1.0 / (HEAD_DIM ** 0.5)

    attn_rows = []
    for n, (s0, cnt) in enumerate(col_spans):        # static unroll over tables
        qn = q[n:n + 1, :] * scale                                       # (1, E)
        kn = k[s0:s0 + cnt, :]                                           # (cnt, E)
        vn = v[s0:s0 + cnt, :]
        prod = qn * kn                                                   # (cnt, E)
        s = jnp.dot(prod, sel, preferred_element_type=jnp.float32)       # (cnt, NH)
        m = jnp.max(s, axis=0, keepdims=True)                            # (1, NH)
        p = jnp.exp(s - m)
        denom = jnp.sum(p, axis=0, keepdims=True)                        # (1, NH)
        p = p * pl.reciprocal(denom, approx=True)                        # softmax / head
        p_exp = jnp.dot(p, selT, preferred_element_type=jnp.float32)      # (cnt, E)
        attn_rows.append(jnp.sum(p_exp * vn, axis=0, keepdims=True))      # (1, E)

    attn = jnp.concatenate(attn_rows, axis=0)                             # (N, E)
    attn = jnp.dot(attn, wo_ref[...], preferred_element_type=jnp.float32) + bo_ref[...]

    # fused residual + F.normalize(p=2, dim=1)
    z = tq + attn
    nrm = jnp.sqrt(jnp.sum(z * z, axis=1, keepdims=True))
    o_ref[...] = z * pl.reciprocal(jnp.maximum(nrm, 1e-12), approx=True)


def pallas_mha_residual_norm(table_emb, col_emb, col_spans, p):
    N = table_emb.shape[0]
    # block-diagonal 0/1 head selector: sel[e, h] = 1 iff feature e belongs to head h
    sel = (jnp.arange(HIDDEN, dtype=jnp.int32)[:, None] // HEAD_DIM
           == jnp.arange(NUM_HEADS, dtype=jnp.int32)[None, :]).astype(jnp.float32)
    return pl.pallas_call(
        functools.partial(_mha_kernel, col_spans=tuple(col_spans)),
        out_shape=jax.ShapeDtypeStruct((N, HIDDEN), jnp.float32),
        in_specs=[_VMEM] * 12,
        out_specs=_VMEM,
    )(table_emb, col_emb,
      p["wq_t"], p["wk_t"], p["wv_t"],
      p["bq"].reshape(1, -1), p["bk"].reshape(1, -1), p["bv"].reshape(1, -1),
      p["wo_t"], p["bo"].reshape(1, -1), sel, sel.T)


# -----------------------------------------------------------------------------
# Parameter construction (deterministic, synthetic).
# -----------------------------------------------------------------------------
def _init(key, shape, scale=0.05):
    return scale * jax.random.normal(key, shape, dtype=jnp.float32)


def make_bilstm_params(keys, input_size, H):
    """Weights stored pre-transposed [in, 4H] and pre-fused [fwd|bwd] along out axis."""
    def lstm_dir(din):
        wih_t = _init(next(keys), (din, 4 * H))
        whh_t = _init(next(keys), (H, 4 * H))
        b = _init(next(keys), (4 * H,))            # b_ih + b_hh summed (PyTorch has both)
        return wih_t, whh_t, b

    wih0f, whh0f, b0f = lstm_dir(input_size)
    wih0b, whh0b, b0b = lstm_dir(input_size)
    wih1f, whh1f, b1f = lstm_dir(2 * H)
    wih1b, whh1b, b1b = lstm_dir(2 * H)
    return {
        "wih0": jnp.concatenate([wih0f, wih0b], axis=1),        # (input_size, 8H)
        "whh0f": whh0f, "whh0b": whh0b,
        "b0": jnp.concatenate([b0f, b0b]).reshape(1, -1),       # (1, 8H)
        "wih1": jnp.concatenate([wih1f, wih1b], axis=1),        # (2H, 8H)
        "whh1f": whh1f, "whh1b": whh1b,
        "b1": jnp.concatenate([b1f, b1b]).reshape(1, -1),
    }


def make_params(vocab_size):
    keys = iter(jax.random.split(jax.random.PRNGKey(0), 256))
    p = {}
    # PLM encoder stub (see TODO above): embedding + tanh projection.
    p["embedding"] = _init(next(keys), (vocab_size, HIDDEN))
    p["enc_w_t"] = _init(next(keys), (HIDDEN, HIDDEN))
    p["enc_b"] = _init(next(keys), (HIDDEN,))
    # classification heads (weights stored transposed: [in, out])
    for name in ["column_info", "table_name"]:
        p[f"{name}_cls1_w_t"] = _init(next(keys), (HIDDEN, CLS_MID))
        p[f"{name}_cls1_b"] = _init(next(keys), (CLS_MID,))
        p[f"{name}_cls2_w_t"] = _init(next(keys), (CLS_MID, 2))
        p[f"{name}_cls2_b"] = _init(next(keys), (2,))
        p[f"{name}_after_pool_w_t"] = _init(next(keys), (HIDDEN, HIDDEN))
        p[f"{name}_after_pool_b"] = _init(next(keys), (HIDDEN,))
        p[f"{name}_bilstm"] = make_bilstm_params(keys, HIDDEN, LSTM_H)
    # multihead cross attention
    p["mha"] = {
        "wq_t": _init(next(keys), (HIDDEN, HIDDEN)),
        "wk_t": _init(next(keys), (HIDDEN, HIDDEN)),
        "wv_t": _init(next(keys), (HIDDEN, HIDDEN)),
        "bq": _init(next(keys), (HIDDEN,)),
        "bk": _init(next(keys), (HIDDEN,)),
        "bv": _init(next(keys), (HIDDEN,)),
        "wo_t": _init(next(keys), (HIDDEN, HIDDEN)),
        "bo": _init(next(keys), (HIDDEN,)),
    }
    return p


# -----------------------------------------------------------------------------
# Forward pass mirroring MyClassifier.forward / table_column_cls.
# -----------------------------------------------------------------------------
def forward(params, encoder_input_ids, encoder_attention_mask,
            batch_aligned_question_ids, batch_aligned_column_info_ids,
            batch_aligned_table_name_ids, batch_column_number_in_each_table):
    B, S = encoder_input_ids.shape

    # ---- PLM encoder stub: embedding lookup + masked tanh projection (one call) ----
    mask = encoder_attention_mask.astype(jnp.float32)
    emb = params["embedding"][encoder_input_ids] * mask[..., None]          # (B, S, H)
    seq_flat = pallas_linear(emb.reshape(B * S, HIDDEN),
                             params["enc_w_t"], params["enc_b"], act="tanh")  # (B*S, H)
    # NOTE: question_token_embeddings are gathered but never used in the reference
    # model, so the gather is skipped here (no effect on outputs).

    # ---- pad + batch every table / column token span across the whole batch ----
    def build_spans(batch_spans):
        t_max = max(len(sp) for spans in batch_spans for sp in spans)
        rows, lens, per_batch = [], [], []
        for b, spans in enumerate(batch_spans):
            per_batch.append(len(spans))
            for sp in spans:
                lens.append(len(sp))
                rows.append([b * S + t for t in sp] + [0] * (t_max - len(sp)))
        return (jnp.asarray(rows, jnp.int32), jnp.asarray(lens, jnp.int32),
                per_batch, t_max)

    tbl_idx, tbl_len, tbl_per_batch, tbl_tmax = build_spans(batch_aligned_table_name_ids)
    col_idx, col_len, col_per_batch, col_tmax = build_spans(batch_aligned_column_info_ids)

    tbl_tokens = jnp.take(seq_flat, tbl_idx.reshape(-1), axis=0).reshape(
        tbl_idx.shape[0], tbl_tmax, HIDDEN)
    col_tokens = jnp.take(seq_flat, col_idx.reshape(-1), axis=0).reshape(
        col_idx.shape[0], col_tmax, HIDDEN)

    # ---- BiLSTM pooling + fused linear-after-pooling + LeakyReLU: one kernel each ----
    table_emb = bilstm_pool_batch(
        tbl_tokens, tbl_len, params["table_name_bilstm"],
        params["table_name_after_pool_w_t"], params["table_name_after_pool_b"])
    column_emb = bilstm_pool_batch(
        col_tokens, col_len, params["column_info_bilstm"],
        params["column_info_after_pool_w_t"], params["column_info_after_pool_b"])

    # ---- cross attention + residual + L2 normalize: one fused kernel over all tables ----
    col_spans = []                        # (start, count) into the global column array
    col_offset = 0
    for b in range(B):
        s0 = col_offset
        for c in batch_column_number_in_each_table[b]:
            col_spans.append((s0, c))
            s0 += c
        col_offset += col_per_batch[b]
    table_emb_attn = pallas_mha_residual_norm(table_emb, column_emb, col_spans,
                                              params["mha"])

    # ---- classification heads (fused linear1+leaky+linear2), batched ----
    table_logits_all = pallas_cls_head(
        table_emb_attn, params["table_name_cls1_w_t"], params["table_name_cls1_b"],
        params["table_name_cls2_w_t"], params["table_name_cls2_b"])
    column_logits_all = pallas_cls_head(
        column_emb, params["column_info_cls1_w_t"], params["column_info_cls1_b"],
        params["column_info_cls2_w_t"], params["column_info_cls2_b"])

    # ---- split back into per-batch-element lists (reference returns lists) ----
    batch_table_name_cls_logits, batch_column_info_cls_logits = [], []
    t_off = c_off = 0
    for b in range(B):
        nt, nc = tbl_per_batch[b], col_per_batch[b]
        batch_table_name_cls_logits.append(table_logits_all[t_off:t_off + nt])
        batch_column_info_cls_logits.append(column_logits_all[c_off:c_off + nc])
        t_off += nt
        c_off += nc
    return {"batch_table_name_cls_logits": batch_table_name_cls_logits,
            "batch_column_info_cls_logits": batch_column_info_cls_logits}


if __name__ == "__main__":
    vocab_size = 100
    batch_size, seq_len = 2, 16

    key = jax.random.PRNGKey(0)
    k_ids, _ = jax.random.split(key)
    encoder_input_ids = jax.random.randint(k_ids, (batch_size, seq_len), 0, vocab_size,
                                           dtype=jnp.int32)
    encoder_attention_mask = jnp.ones((batch_size, seq_len), dtype=jnp.int32)

    # alignment metadata (Python lists of token indices, as in the reference model)
    batch_aligned_question_ids = [[0, 1, 2, 3], [0, 1, 2]]
    batch_aligned_table_name_ids = [
        [[4, 5], [6, 7]],                     # 2 tables
        [[4, 5, 6], [7, 8]],
    ]
    batch_aligned_column_info_ids = [
        [[8, 9], [10, 11], [12, 13], [14, 15], [8, 10], [9, 11]],   # 6 columns
        [[9, 10], [11, 12], [13, 14], [15, 8], [10, 12], [11, 13]],
    ]
    batch_column_number_in_each_table = [[3, 3], [3, 3]]

    params = make_params(vocab_size)

    out = forward(params, encoder_input_ids, encoder_attention_mask,
                  batch_aligned_question_ids, batch_aligned_column_info_ids,
                  batch_aligned_table_name_ids, batch_column_number_in_each_table)

    for logits in out["batch_table_name_cls_logits"] + out["batch_column_info_cls_logits"]:
        jax.block_until_ready(logits)

    print("KERNEL_OK")
</pallas_src>

<mosaic_0001>
module attributes {stable_mosaic.version = 11 : i64} {
  func.func @_linear_kernel(%arg0: memref<32x32xf32, #tpu.memory_space<vmem>>, %arg1: memref<32x32xf32, #tpu.memory_space<vmem>>, %arg2: memref<1x32xf32, #tpu.memory_space<vmem>>, %arg3: memref<32x32xf32, #tpu.memory_space<vmem>>) attributes {dimension_semantics = [], scalar_prefetch = 0 : i64, scratch_operands = 0 : i64, tpu.core_type = #tpu.core_type<tc>} {
    %c0 = arith.constant 0 : index
    %c0_0 = arith.constant 0 : index
    %0 = vector.load %arg0[%c0, %c0_0] : memref<32x32xf32, #tpu.memory_space<vmem>>, vector<32x32xf32>
    %c0_1 = arith.constant 0 : index
    %c0_2 = arith.constant 0 : index
    %1 = vector.load %arg1[%c0_1, %c0_2] : memref<32x32xf32, #tpu.memory_space<vmem>>, vector<32x32xf32>
    %cst = arith.constant dense<0.000000e+00> : vector<32x32xf32>
    %2 = tpu.matmul %0, %1, %cst {dimension_numbers = #tpu.dot_dimension_numbers<[1], [0], [0], [1], [0, 0, 1, 1], [], []>} : vector<32x32xf32>, vector<32x32xf32>, vector<32x32xf32> -> vector<32x32xf32>
    %c0_3 = arith.constant 0 : index
    %c0_4 = arith.constant 0 : index
    %3 = vector.load %arg2[%c0_3, %c0_4] : memref<1x32xf32, #tpu.memory_space<vmem>>, vector<1x32xf32>
    %4 = vector.broadcast %3 : vector<1x32xf32> to vector<32x32xf32>
    %5 = arith.addf %2, %4 : vector<32x32xf32>
    %6 = math.tanh %5 : vector<32x32xf32>
    %c0_5 = arith.constant 0 : index
    %c0_6 = arith.constant 0 : index
    %7 = vector.load %arg3[%c0_5, %c0_6] : memref<32x32xf32, #tpu.memory_space<vmem>>, vector<32x32xf32>
    tpu.vector_store %arg3[%c0_5, %c0_6], %6 {strides = array<i32>} : memref<32x32xf32, #tpu.memory_space<vmem>>, vector<32x32xf32>,
    return
  }
}

</mosaic_0001>

<bundles_post_ra>
// kernel: tpu_custom_call.1
= control target key start
LH: loop header
LB: loop body
LE: loop exit
PB: predicated region body
PF: predicated region fallthrough
CT: control target
= control target key end

     0   :  { %8 = vsyncpa [#allocation3], 0  ;;  %s387_s0 = inlined_call_operand.hbm [shape: f32[32,32], index: 0, kind: input, shape index: {}]   ;;  %s388_s1 = inlined_call_operand.hbm [shape: f32[32,32], index: 1, kind: input, shape index: {}]   ;;  %s389_s2 = inlined_call_operand.vmem [shape: f32[1,32], index: 2, kind: input, shape index: {}]   ;;  %s390_s3 = inlined_call_operand.hbm [shape: f32[32,32], index: 3, kind: output, shape index: {}]  }
   0x1   :  { %9 = vsyncpa [#allocation6], 0 }
   0x2   :  { %10 = vsyncpa [#allocation4], 0  ;;  %s306_s12 = smov [#allocation2]   ;;  %s234_s16 = scalar_lea.hbm %s387_s0, 512 }
   0x3   :  { %s16_s13 = sshll.u32 %s306_s12, 4  ;;  %p235_p0 = scmp.ne.s32.totalorder %s387_s0, %s234_s16  ;;  %s17_s13 = int_to_ptr.vmem [resolvable:$true] %s16_s13 }
   0x4   :  { %p238_p1 = scmp.lt.u32.totalorder %s234_s16, %s387_s0 }
   0x6   :  { %p240_p2 = pnand %p238_p1, %p235_p0 }
   0x8   :  { %243 = shalt.err (!%p240_p2)
}
   0x9   :  { %s244_s21 = scalar_lea.vmem %s17_s13, 512  ;;  %p249_p4 = scmp.lt.s32.totalorder %s17_s13, %s17_s13 }
   0xa   :  { %p245_p3 = scmp.ne.s32.totalorder %s17_s13, %s244_s21  ;;  %p250_p5 = scmp.lt.s32.totalorder %s244_s21, %s244_s21 }
   0xc   :  { %p251_p6 = por %p250_p5, %p249_p4 }
   0xe   :  { %p252_p7 = pnand %p251_p6, %p245_p3 }
  0x10   :  { %255 = shalt.err (!%p252_p7)
}
  0x11   :  { %s307_s22 = smov 128   ;;  %s308_s23 = smov 8  }
  0x12   :  { %22 = dma.hbm_to_vmem [thread:$0]  %s387_s0, 512, %s17_s13, [#allocation3], %s307_s22, %s307_s22, %s308_s23  }
  0x13   :  { %s309_s26 = smov [#allocation5]   ;;  %s256_s30 = scalar_lea.hbm %s388_s1, 512 }
  0x14   :  { %s28_s27 = sshll.u32 %s309_s26, 4  ;;  %p257_p8 = scmp.ne.s32.totalorder %s388_s1, %s256_s30  ;;  %s29_s27 = int_to_ptr.vmem [resolvable:$true] %s28_s27 }
  0x15   :  { %p260_p9 = scmp.lt.u32.totalorder %s256_s30, %s388_s1 }
  0x17   :  { %p262_p10 = pnand %p260_p9, %p257_p8 }
  0x19   :  { %265 = shalt.err (!%p262_p10)
}
  0x1a   :  { %s266_s8 = scalar_lea.vmem %s29_s27, 512  ;;  %p271_p12 = scmp.lt.s32.totalorder %s29_s27, %s29_s27 }
  0x1b   :  { %p267_p11 = scmp.ne.s32.totalorder %s29_s27, %s266_s8  ;;  %p272_p13 = scmp.lt.s32.totalorder %s266_s8, %s266_s8 }
  0x1d   :  { %p273_p0 = por %p272_p13, %p271_p12 }
  0x1f   :  { %p274_p1 = pnand %p273_p0, %p267_p11 }
  0x21   :  { %277 = shalt.err (!%p274_p1)
}
  0x22   :  { %34 = dma.hbm_to_vmem [thread:$0]  %s388_s1, 512, %s29_s27, [#allocation6], %s307_s22, %s307_s22, %s308_s23  }
  0x23   :  { %300 = dma.done.wait [#allocation3], 512  }
  0x24   :  { %301 = vsyncadd [#allocation3], 4294966784 }
  0x25   :  { %302 = dma.done.wait [#allocation6], 512  }
  0x26   :  { %303 = vsyncadd [#allocation6], 4294966784  ;;  %vm58_vm0 = vcmask 261120   ;;  %v47_v0 = vld [vmem:[#allocation5] sm:$0xff]  ;;  %v48_v1 = vld [vmem:[#allocation5 + $0x8] sm:$0xff]  ;;  %s310_s11 = smov [#allocation7]  }
  0x27   :  { %v49_v2 = vld [vmem:[#allocation5 + $0x10] sm:$0xff]  ;;  %v209_v3 = vpack.c.bf16 %v48_v1, %v47_v0  ;;  %v50_v4 = vld [vmem:[#allocation5 + $0x18] sm:$0xff]  ;;  %v43_v5 = vld [vmem:[#allocation2] sm:$0xff]  ;;  %s169_s12 = sshll.u32 %s310_s11, 4  ;;  %s170_s12 = int_to_ptr.vmem [resolvable:$true] %s169_s12 }
  0x28   :  { %v45_v6 = vld [vmem:[#allocation2 + $0x10] sm:$0xff]  ;;  %v213_v7 = vpack.c.bf16 %v50_v4, %v49_v2  ;;  %203 = vmatprep.mubr.msk.f32.mxu0 %vm58_vm0, %v43_v5  ;;  %v44_v8 = vld [vmem:[#allocation2 + $0x8] sm:$0xff]  ;;  %v46_v9 = vld [vmem:[#allocation2 + $0x18] sm:$0xff]  ;;  %p283_p3 = scmp.lt.s32.totalorder %s170_s12, %s170_s12 }
  0x29   :  { %206 = vmatprep.mubr.msk.f32.mxu1 %vm58_vm0, %v45_v6  ;;  %210 = vmatprep.subr.bf16.mxu0 %v209_v3  ;;  %v182_v10 = vld [vmem:[%s389_s2] ss:$0 sm:$0xff]  ;;  %s278_s2 = scalar_lea.vmem %s170_s12, 512 }
  0x2a   :  { %217 = vmatprep.subr.bf16.mxu1 %v209_v3  ;;  %212 = vmatpush3.bf16.msra.mxu0 %v209_v3  ;;  %p279_p2 = scmp.ne.s32.totalorder %s170_s12, %s278_s2  ;;  %p284_p4 = scmp.lt.s32.totalorder %s278_s2, %s278_s2 }
  0x2b   :  { %219 = vmatpush3.bf16.msra.mxu1 %v209_v3  ;;  %214 = vmatprep.subr.bf16.mxu0 %v213_v7 }
  0x2c   :  { %218 = vmatprep.subr.bf16.mxu1 %v213_v7  ;;  %p285_p5 = por %p284_p4, %p283_p3 }
  0x2e   :  { %216 = vmatpush3.bf16.msra.mxu0 %v213_v7  ;;  %p286_p6 = pnand %p285_p5, %p279_p2 }
  0x2f   :  { %220 = vmatpush3.bf16.msra.mxu1 %v213_v7 }
  0x31   :  { %204 = vmatmul.mubr.msk.f32.vlgmr.msra.gmra.mrb[0].mxu0 %vm58_vm0, %v44_v8 }
  0x32   :  { %207 = vmatmul.mubr.msk.f32.vlgmr.msra.gmra.mrb[0].mxu1 %vm58_vm0, %v46_v9 }
 0x104   :  { %v205_v11 = vpop.f32.mrb[0].mxu0 }
 0x105   :  { %v208_v12 = vpop.f32.mrb[0].mxu1  ;;  %v143_v13 = vadd.f32 %v205_v11, %v182_v10  ;;  %v137_v15 = vpop.f32.mrb[1].mxu0 }
 0x106   :  { %v153_v14 = vadd.f32 %v208_v12, %v182_v10  ;;  %v147_v16 = vpop.f32.mrb[1].mxu1  ;;  %v138_v17 = vadd.f32 %v182_v10, %v137_v15 }
 0x107   :  { %v148_v18 = vadd.f32 %v182_v10, %v147_v16  ;;  %226 = vtanh.f32 %v143_v13 }
 0x108   :  { %228 = vtanh.f32 %v153_v14 }
 0x109   :  { %230 = vtanh.f32 %v138_v17 }
 0x10a   :  { %232 = vtanh.f32 %v148_v18 }
 0x111   :  { %v227_v19 = vpop.eup %226 }
 0x112   :  { %v229_v20 = vpop.eup %228  ;;  %161 = vst.msk [vmem:[#allocation7 + $0x8] sm:$0xff] %vm58_vm0, %v227_v19 }
 0x113   :  { %v231_v21 = vpop.eup %230  ;;  %163 = vst.msk [vmem:[#allocation7 + $0x18] sm:$0xff] %vm58_vm0, %v229_v20 }
 0x114   :  { %v233_v22 = vpop.eup %232  ;;  %160 = vst.msk [vmem:[#allocation7] sm:$0xff] %vm58_vm0, %v231_v21 }
 0x115   :  { %162 = vst.msk [vmem:[#allocation7 + $0x10] sm:$0xff] %vm58_vm0, %v233_v22 }
 0x116   :  { %289 = shalt.err (!%p286_p6)
}
 0x117   :  { %s290_s15 = scalar_lea.hbm %s390_s3, 512 }
 0x118   :  { %p291_p7 = scmp.ne.s32.totalorder %s390_s3, %s290_s15  ;;  %p294_p8 = scmp.lt.u32.totalorder %s290_s15, %s390_s3 }
 0x11a   :  { %p296_p9 = pnand %p294_p8, %p291_p7 }
 0x11c   :  { %299 = shalt.err (!%p296_p9)
}
 0x11d   :  { %175 = dma.vmem_to_hbm [thread:$0]  %s170_s12, 512, %s390_s3, [#allocation4], %s307_s22, %s307_s22, %s308_s23  }
 0x11e   :  { %304 = dma.done.wait [#allocation4], 512  }
 0x11f   :  { %305 = vsyncadd [#allocation4], 4294966784 }
 0x120   :  { %179 = vsyncpa [#allocation3], 1 }
 0x121   :  { %180 = vsyncpa [#allocation6], 1 }
 0x122   :  { %181 = vsyncpa [#allocation4], 1 }

</bundles_post_ra>
